<compile_context>
chip_gen: v6e
topology: v6e:2x2x1
jax: 0.10.0
libtpu: 0.0.40
codegen_flags: <defaults>
</compile_context>

<pallas_src>
import functools

import jax
import jax.numpy as jnp
from jax import lax
from jax.experimental import pallas as pl
from jax.experimental.pallas import tpu as pltpu

LANES = 128


def _pick_divisor(n, candidates):
    for c in candidates:
        if n % c == 0:
            return c
    return 1


def _vmem_limit_bytes():
    try:
        cap = int(pltpu.get_tpu_info().vmem_capacity_bytes)
    except Exception:
        cap = 64 * 1024 * 1024
    # Leave headroom for compiler-internal scratch and pipeline double buffers.
    return max(32 * 1024 * 1024, min(cap - 16 * 1024 * 1024, 100 * 1024 * 1024))


def _make_conv1d_kernel(S, TBLK, Kpad, P, TS, TT, U, x_dtype, out_dtype):
    """Depthwise 1-D conv along the leading dim of an (S, TBLK, LANES) slab."""
    n_tap_blocks = Kpad // U
    rows = S + Kpad - 1            # padded-scratch rows
    halo_lo = P                    # leading zero rows
    halo_hi = rows - S - P         # trailing zero rows (>= P; extra rows hit zero taps)

    def kernel(w_ref, b_ref, x_ref, o_ref, xpad_s):
        # ---- zero the halo rows once per (n, t) group --------------------------
        # The innermost grid axis (channel blocks) is 'arbitrary' -> never split
        # across cores and always starts at 0 for each (n, t) a core owns.  The
        # halos are never overwritten afterwards (interior writes cover [P, P+S)).
        if halo_lo > 0 or halo_hi > 0:
            @pl.when(pl.program_id(2) == 0)
            def _zero_halos():
                if halo_lo > 0:
                    xpad_s[0:halo_lo] = jnp.zeros((halo_lo, TBLK, LANES), x_dtype)
                if halo_hi > 0:
                    xpad_s[P + S:rows] = jnp.zeros((halo_hi, TBLK, LANES), x_dtype)

        # ---- stage the block interior (2 slab passes vs Kpad tap passes below) --
        xpad_s[P:P + S] = x_ref[...]

        bias = b_ref[...].astype(jnp.float32)                     # (1, 1, LANES)

        # ---- produce the output in small register-resident tiles ----------------
        for s0 in range(0, S, TS):                                # static
            for t0 in range(0, TBLK, TT):                         # static
                def tap_block(j, acc, s0=s0, t0=t0):
                    base = j * U
                    for r in range(U):                            # U taps / iteration
                        wk = w_ref[pl.ds(base + r, 1)].astype(jnp.float32)  # (1,1,LANES)
                        xs = xpad_s[pl.ds(s0 + base + r, TS), pl.ds(t0, TT), :]
                        acc = acc + wk * xs.astype(jnp.float32)
                    return acc

                acc = lax.fori_loop(0, n_tap_blocks, tap_block,
                                    jnp.zeros((TS, TT, LANES), jnp.float32))
                o_ref[s0:s0 + TS, t0:t0 + TT, :] = (acc + bias).astype(out_dtype)

    return kernel


def _depthwise_conv1d_leading(x, w, b, K):
    """x: (N, S, T, Cp) with Cp % 128 == 0; w: (K, 1, Cp); b: (1, 1, Cp).

    Depthwise conv of length K along S ('same' zero padding) + per-channel bias.
    """
    N, S, T, Cp = x.shape
    assert Cp % LANES == 0 and K % 2 == 1
    P = K // 2

    U = 8 if K >= 8 else K                        # taps per fori_loop iteration
    Kpad = ((K + U - 1) // U) * U                 # zero-pad taps -> no loop tail
    if Kpad != K:
        w = jnp.pad(w, ((0, Kpad - K), (0, 0), (0, 0)))

    TBLK = 64 if T % 64 == 0 else T               # T-tiling: VMEM + parallel grid steps
    TS = _pick_divisor(S, (8, 4, 2))              # output row tile (leading dim)
    TT = _pick_divisor(TBLK, (16, 8, 4, 2))       # output col tile (sublane dim)

    kernel = _make_conv1d_kernel(S, TBLK, Kpad, P, TS, TT, U, x.dtype, x.dtype)

    return pl.pallas_call(
        kernel,
        out_shape=jax.ShapeDtypeStruct((N, S, T, Cp), x.dtype),
        grid=(N, T // TBLK, Cp // LANES),
        in_specs=[
            pl.BlockSpec((Kpad, 1, LANES), lambda n, t, c: (0, 0, c)),       # taps
            pl.BlockSpec((1, 1, LANES), lambda n, t, c: (0, 0, c)),          # bias
            pl.BlockSpec((pl.Squeezed(), S, TBLK, LANES),
                         lambda n, t, c: (n, 0, t, c)),                      # input slab
        ],
        out_specs=pl.BlockSpec((pl.Squeezed(), S, TBLK, LANES),
                               lambda n, t, c: (n, 0, t, c)),
        scratch_shapes=[pltpu.VMEM((S + Kpad - 1, TBLK, LANES), x.dtype)],   # padded input
        compiler_params=pltpu.CompilerParams(
            dimension_semantics=("parallel", "parallel", "arbitrary"),
            vmem_limit_bytes=_vmem_limit_bytes()),
    )(w, b, x)


@functools.partial(jax.jit, static_argnums=(5,))
def spatial_oversize_conv2d(x, h_weight, w_weight, h_bias, w_bias, kernel_size):
    """Forward of SpatialOversizeConv2d (interpolate=False).

    x: (N, C, H, W); h_weight: (C,1,K,1); w_weight: (C,1,1,K); biases: (C,).
    """
    N, C, H, W = x.shape
    K = kernel_size
    assert K % 2 == 1

    Cp = ((C + LANES - 1) // LANES) * LANES
    cpad = Cp - C

    # Layout plumbing (wrapper side, fused by XLA): channels onto the lane axis,
    # zero-padded to a multiple of 128 so every vector op is lane-dense.
    x_nhwc = jnp.transpose(x, (0, 2, 3, 1))                            # (N, H, W, C)
    wh = jnp.transpose(h_weight.reshape(C, K)).astype(jnp.float32)     # (K, C)
    ww = jnp.transpose(w_weight.reshape(C, K)).astype(jnp.float32)
    bh = h_bias.astype(jnp.float32)
    bw = w_bias.astype(jnp.float32)
    if cpad:
        x_nhwc = jnp.pad(x_nhwc, ((0, 0), (0, 0), (0, 0), (0, cpad)))
        wh = jnp.pad(wh, ((0, 0), (0, cpad)))
        ww = jnp.pad(ww, ((0, 0), (0, cpad)))
        bh = jnp.pad(bh, (0, cpad))
        bw = jnp.pad(bw, (0, cpad))
    wh = wh.reshape(K, 1, Cp)
    ww = ww.reshape(K, 1, Cp)
    bh = bh.reshape(1, 1, Cp)
    bw = bw.reshape(1, 1, Cp)

    # Pass 1: depthwise conv along H (H is the leading spatial dim of the slab).
    y = _depthwise_conv1d_leading(x_nhwc, wh, bh, K)                   # (N, H, W, Cp)
    # Pass 2: depthwise conv along W; one HBM transpose so W becomes leading,
    # keeping both convs' tap shifts on the leading (address-offset) dim.
    y = jnp.transpose(y, (0, 2, 1, 3))                                 # (N, W, H, Cp)
    y = _depthwise_conv1d_leading(y, ww, bw, K)                        # (N, W, H, Cp)

    out = jnp.transpose(y, (0, 3, 2, 1))                               # (N, Cp, H, W)
    return out[:, :C] if cpad else out


def _reference(x, h_weight, w_weight, h_bias, w_bias, kernel_size):
    """Pure-JAX reference matching F.conv2d with groups=dim."""
    C = x.shape[1]
    P = kernel_size // 2
    dn = ("NCHW", "OIHW", "NCHW")
    y = lax.conv_general_dilated(x, h_weight, window_strides=(1, 1),
                                 padding=((P, P), (0, 0)),
                                 dimension_numbers=dn, feature_group_count=C)
    y = y + h_bias[None, :, None, None]
    y = lax.conv_general_dilated(y, w_weight, window_strides=(1, 1),
                                 padding=((0, 0), (P, P)),
                                 dimension_numbers=dn, feature_group_count=C)
    y = y + w_bias[None, :, None, None]
    return y


if __name__ == "__main__":
    # Small shapes consistent with the module (dim channels, odd kernel_size).
    N, C, H, W = 2, 4, 16, 16
    K = 5

    key = jax.random.PRNGKey(0)
    kx, kwh, kww, kbh, kbw = jax.random.split(key, 5)

    x = jax.random.normal(kx, (N, C, H, W), dtype=jnp.float32)
    # PyTorch Conv2d parameter shapes:
    #   conv_h.weight: (dim, 1, K, 1), conv_w.weight: (dim, 1, 1, K), biases: (dim,)
    h_weight = 0.1 * jax.random.normal(kwh, (C, 1, K, 1), dtype=jnp.float32)
    w_weight = 0.1 * jax.random.normal(kww, (C, 1, 1, K), dtype=jnp.float32)
    h_bias = 0.1 * jax.random.normal(kbh, (C,), dtype=jnp.float32)
    w_bias = 0.1 * jax.random.normal(kbw, (C,), dtype=jnp.float32)

    out = spatial_oversize_conv2d(x, h_weight, w_weight, h_bias, w_bias, K)
    out = jax.block_until_ready(out)

    ref = _reference(x, h_weight, w_weight, h_bias, w_bias, K)
    assert out.shape == (N, C, H, W), out.shape
    assert jnp.allclose(out, ref, atol=1e-4, rtol=1e-4), \
        float(jnp.max(jnp.abs(out - ref)))

    print("KERNEL_OK")
</pallas_src>

<mosaic_0001>
module attributes {stable_mosaic.version = 11 : i64} {
  func.func @kernel(%arg0: i32, %arg1: i32, %arg2: i32, %arg3: memref<5x1x128xf32, #tpu.memory_space<vmem>>, %arg4: memref<1x1x128xf32, #tpu.memory_space<vmem>>, %arg5: memref<1x16x16x128xf32, #tpu.memory_space<vmem>>, %arg6: memref<1x16x16x128xf32, #tpu.memory_space<vmem>>, %arg7: memref<20x16x128xf32, #tpu.memory_space<vmem>>) attributes {dimension_semantics = [#tpu.dimension_semantics<parallel>, #tpu.dimension_semantics<parallel>, #tpu.dimension_semantics<arbitrary>], iteration_bounds = array<i64: 2, 1, 1>, scalar_prefetch = 0 : i64, scratch_operands = 1 : i64, tpu.core_type = #tpu.core_type<tc>, window_params = [{transform_indices = @transform_0, window_bounds = array<i64: 5, 1, 128>}, {transform_indices = @transform_1, window_bounds = array<i64: 1, 1, 128>}, {transform_indices = @transform_2, window_bounds = array<i64: 1, 16, 16, 128>}, {transform_indices = @transform_3, window_bounds = array<i64: 1, 16, 16, 128>}]} {
    %c0_i32 = arith.constant 0 : i32
    %0 = arith.cmpi eq, %arg2, %c0_i32 : i32
    %1 = arith.extui %0 : i1 to i32
    %c0_i32_0 = arith.constant 0 : i32
    %2 = arith.cmpi ne, %1, %c0_i32_0 : i32
    scf.if %2 {
      %cst_87 = arith.constant 0.000000e+00 : f32
      %121 = vector.broadcast %cst_87 : f32 to vector<2x16x128xf32>
      %c0_88 = arith.constant 0 : index
      %c0_89 = arith.constant 0 : index
      %c0_90 = arith.constant 0 : index
      %122 = vector.load %arg7[%c0_88, %c0_89, %c0_90] : memref<20x16x128xf32, #tpu.memory_space<vmem>>, vector<2x16x128xf32>
      tpu.vector_store %arg7[%c0_88, %c0_89, %c0_90], %121 {strides = array<i32>} : memref<20x16x128xf32, #tpu.memory_space<vmem>>, vector<2x16x128xf32>,
      %cst_91 = arith.constant 0.000000e+00 : f32
      %123 = vector.broadcast %cst_91 : f32 to vector<2x16x128xf32>
      %c18 = arith.constant 18 : index
      %c0_92 = arith.constant 0 : index
      %c0_93 = arith.constant 0 : index
      %124 = vector.load %arg7[%c18, %c0_92, %c0_93] : memref<20x16x128xf32, #tpu.memory_space<vmem>>, vector<2x16x128xf32>
      tpu.vector_store %arg7[%c18, %c0_92, %c0_93], %123 {strides = array<i32>} : memref<20x16x128xf32, #tpu.memory_space<vmem>>, vector<2x16x128xf32>,
    } else {
    }
    %c0 = arith.constant 0 : index
    %c0_1 = arith.constant 0 : index
    %c0_2 = arith.constant 0 : index
    %c0_3 = arith.constant 0 : index
    %3 = vector.load %arg5[%c0, %c0_1, %c0_2, %c0_3] : memref<1x16x16x128xf32, #tpu.memory_space<vmem>>, vector<1x16x16x128xf32>
    %4 = vector.shape_cast %3 : vector<1x16x16x128xf32> to vector<16x16x128xf32>
    %c2 = arith.constant 2 : index
    %c0_4 = arith.constant 0 : index
    %c0_5 = arith.constant 0 : index
    %5 = vector.load %arg7[%c2, %c0_4, %c0_5] : memref<20x16x128xf32, #tpu.memory_space<vmem>>, vector<16x16x128xf32>
    tpu.vector_store %arg7[%c2, %c0_4, %c0_5], %4 {strides = array<i32>} : memref<20x16x128xf32, #tpu.memory_space<vmem>>, vector<16x16x128xf32>,
    %c0_6 = arith.constant 0 : index
    %c0_7 = arith.constant 0 : index
    %c0_8 = arith.constant 0 : index
    %6 = vector.load %arg4[%c0_6, %c0_7, %c0_8] : memref<1x1x128xf32, #tpu.memory_space<vmem>>, vector<1x1x128xf32>
    %cst = arith.constant 0.000000e+00 : f32
    %7 = vector.broadcast %cst : f32 to vector<8x16x128xf32>
    %c0_i32_9 = arith.constant 0 : i32
    %c5_i32 = arith.constant 5 : i32
    %8 = arith.muli %c0_i32_9, %c5_i32 : i32
    %c0_i32_10 = arith.constant 0 : i32
    %9 = arith.addi %8, %c0_i32_10 : i32
    %10 = arith.index_cast %9 : i32 to index
    %c0_11 = arith.constant 0 : index
    %c0_12 = arith.constant 0 : index
    %11 = vector.load %arg3[%10, %c0_11, %c0_12] : memref<5x1x128xf32, #tpu.memory_space<vmem>>, vector<1x1x128xf32>
    %c0_i32_13 = arith.constant 0 : i32
    %12 = arith.addi %c0_i32_13, %8 : i32
    %c0_i32_14 = arith.constant 0 : i32
    %13 = arith.addi %12, %c0_i32_14 : i32
    %14 = arith.index_cast %13 : i32 to index
    %c0_15 = arith.constant 0 : index
    %c0_16 = arith.constant 0 : index
    %15 = vector.load %arg7[%14, %c0_15, %c0_16] : memref<20x16x128xf32, #tpu.memory_space<vmem>>, vector<8x16x128xf32>
    %16 = vector.broadcast %11 : vector<1x1x128xf32> to vector<8x16x128xf32>
    %17 = arith.mulf %16, %15 : vector<8x16x128xf32>
    %18 = arith.addf %7, %17 : vector<8x16x128xf32>
    %c1_i32 = arith.constant 1 : i32
    %19 = arith.addi %8, %c1_i32 : i32
    %20 = arith.index_cast %19 : i32 to index
    %c0_17 = arith.constant 0 : index
    %c0_18 = arith.constant 0 : index
    %21 = vector.load %arg3[%20, %c0_17, %c0_18] : memref<5x1x128xf32, #tpu.memory_space<vmem>>, vector<1x1x128xf32>
    %c0_i32_19 = arith.constant 0 : i32
    %22 = arith.addi %c0_i32_19, %8 : i32
    %c1_i32_20 = arith.constant 1 : i32
    %23 = arith.addi %22, %c1_i32_20 : i32
    %24 = arith.index_cast %23 : i32 to index
    %c0_21 = arith.constant 0 : index
    %c0_22 = arith.constant 0 : index
    %25 = vector.load %arg7[%24, %c0_21, %c0_22] : memref<20x16x128xf32, #tpu.memory_space<vmem>>, vector<8x16x128xf32>
    %26 = vector.broadcast %21 : vector<1x1x128xf32> to vector<8x16x128xf32>
    %27 = arith.mulf %26, %25 : vector<8x16x128xf32>
    %28 = arith.addf %18, %27 : vector<8x16x128xf32>
    %c2_i32 = arith.constant 2 : i32
    %29 = arith.addi %8, %c2_i32 : i32
    %30 = arith.index_cast %29 : i32 to index
    %c0_23 = arith.constant 0 : index
    %c0_24 = arith.constant 0 : index
    %31 = vector.load %arg3[%30, %c0_23, %c0_24] : memref<5x1x128xf32, #tpu.memory_space<vmem>>, vector<1x1x128xf32>
    %c0_i32_25 = arith.constant 0 : i32
    %32 = arith.addi %c0_i32_25, %8 : i32
    %c2_i32_26 = arith.constant 2 : i32
    %33 = arith.addi %32, %c2_i32_26 : i32
    %34 = arith.index_cast %33 : i32 to index
    %c0_27 = arith.constant 0 : index
    %c0_28 = arith.constant 0 : index
    %35 = vector.load %arg7[%34, %c0_27, %c0_28] : memref<20x16x128xf32, #tpu.memory_space<vmem>>, vector<8x16x128xf32>
    %36 = vector.broadcast %31 : vector<1x1x128xf32> to vector<8x16x128xf32>
    %37 = arith.mulf %36, %35 : vector<8x16x128xf32>
    %38 = arith.addf %28, %37 : vector<8x16x128xf32>
    %c3_i32 = arith.constant 3 : i32
    %39 = arith.addi %8, %c3_i32 : i32
    %40 = arith.index_cast %39 : i32 to index
    %c0_29 = arith.constant 0 : index
    %c0_30 = arith.constant 0 : index
    %41 = vector.load %arg3[%40, %c0_29, %c0_30] : memref<5x1x128xf32, #tpu.memory_space<vmem>>, vector<1x1x128xf32>
    %c0_i32_31 = arith.constant 0 : i32
    %42 = arith.addi %c0_i32_31, %8 : i32
    %c3_i32_32 = arith.constant 3 : i32
    %43 = arith.addi %42, %c3_i32_32 : i32
    %44 = arith.index_cast %43 : i32 to index
    %c0_33 = arith.constant 0 : index
    %c0_34 = arith.constant 0 : index
    %45 = vector.load %arg7[%44, %c0_33, %c0_34] : memref<20x16x128xf32, #tpu.memory_space<vmem>>, vector<8x16x128xf32>
    %46 = vector.broadcast %41 : vector<1x1x128xf32> to vector<8x16x128xf32>
    %47 = arith.mulf %46, %45 : vector<8x16x128xf32>
    %48 = arith.addf %38, %47 : vector<8x16x128xf32>
    %c4_i32 = arith.constant 4 : i32
    %49 = arith.addi %8, %c4_i32 : i32
    %50 = arith.index_cast %49 : i32 to index
    %c0_35 = arith.constant 0 : index
    %c0_36 = arith.constant 0 : index
    %51 = vector.load %arg3[%50, %c0_35, %c0_36] : memref<5x1x128xf32, #tpu.memory_space<vmem>>, vector<1x1x128xf32>
    %c0_i32_37 = arith.constant 0 : i32
    %52 = arith.addi %c0_i32_37, %8 : i32
    %c4_i32_38 = arith.constant 4 : i32
    %53 = arith.addi %52, %c4_i32_38 : i32
    %54 = arith.index_cast %53 : i32 to index
    %c0_39 = arith.constant 0 : index
    %c0_40 = arith.constant 0 : index
    %55 = vector.load %arg7[%54, %c0_39, %c0_40] : memref<20x16x128xf32, #tpu.memory_space<vmem>>, vector<8x16x128xf32>
    %56 = vector.broadcast %51 : vector<1x1x128xf32> to vector<8x16x128xf32>
    %57 = arith.mulf %56, %55 : vector<8x16x128xf32>
    %58 = arith.addf %48, %57 : vector<8x16x128xf32>
    %c1_i32_41 = arith.constant 1 : i32
    %59 = vector.broadcast %6 : vector<1x1x128xf32> to vector<8x16x128xf32>
    %60 = arith.addf %58, %59 : vector<8x16x128xf32>
    %c0_42 = arith.constant 0 : index
    %c0_43 = arith.constant 0 : index
    %c0_44 = arith.constant 0 : index
    %c0_45 = arith.constant 0 : index
    %61 = vector.load %arg6[%c0_42, %c0_43, %c0_44, %c0_45] : memref<1x16x16x128xf32, #tpu.memory_space<vmem>>, vector<1x8x16x128xf32>
    %62 = vector.shape_cast %61 : vector<1x8x16x128xf32> to vector<8x16x128xf32>
    %63 = vector.shape_cast %60 : vector<8x16x128xf32> to vector<1x8x16x128xf32>
    tpu.vector_store %arg6[%c0_42, %c0_43, %c0_44, %c0_45], %63 {strides = array<i32>} : memref<1x16x16x128xf32, #tpu.memory_space<vmem>>, vector<1x8x16x128xf32>,
    %cst_46 = arith.constant 0.000000e+00 : f32
    %64 = vector.broadcast %cst_46 : f32 to vector<8x16x128xf32>
    %c0_i32_47 = arith.constant 0 : i32
    %c5_i32_48 = arith.constant 5 : i32
    %65 = arith.muli %c0_i32_47, %c5_i32_48 : i32
    %c0_i32_49 = arith.constant 0 : i32
    %66 = arith.addi %65, %c0_i32_49 : i32
    %67 = arith.index_cast %66 : i32 to index
    %c0_50 = arith.constant 0 : index
    %c0_51 = arith.constant 0 : index
    %68 = vector.load %arg3[%67, %c0_50, %c0_51] : memref<5x1x128xf32, #tpu.memory_space<vmem>>, vector<1x1x128xf32>
    %c8_i32 = arith.constant 8 : i32
    %69 = arith.addi %c8_i32, %65 : i32
    %c0_i32_52 = arith.constant 0 : i32
    %70 = arith.addi %69, %c0_i32_52 : i32
    %71 = arith.index_cast %70 : i32 to index
    %c0_53 = arith.constant 0 : index
    %c0_54 = arith.constant 0 : index
    %72 = vector.load %arg7[%71, %c0_53, %c0_54] : memref<20x16x128xf32, #tpu.memory_space<vmem>>, vector<8x16x128xf32>
    %73 = vector.broadcast %68 : vector<1x1x128xf32> to vector<8x16x128xf32>
    %74 = arith.mulf %73, %72 : vector<8x16x128xf32>
    %75 = arith.addf %64, %74 : vector<8x16x128xf32>
    %c1_i32_55 = arith.constant 1 : i32
    %76 = arith.addi %65, %c1_i32_55 : i32
    %77 = arith.index_cast %76 : i32 to index
    %c0_56 = arith.constant 0 : index
    %c0_57 = arith.constant 0 : index
    %78 = vector.load %arg3[%77, %c0_56, %c0_57] : memref<5x1x128xf32, #tpu.memory_space<vmem>>, vector<1x1x128xf32>
    %c8_i32_58 = arith.constant 8 : i32
    %79 = arith.addi %c8_i32_58, %65 : i32
    %c1_i32_59 = arith.constant 1 : i32
    %80 = arith.addi %79, %c1_i32_59 : i32
    %81 = arith.index_cast %80 : i32 to index
    %c0_60 = arith.constant 0 : index
    %c0_61 = arith.constant 0 : index
    %82 = vector.load %arg7[%81, %c0_60, %c0_61] : memref<20x16x128xf32, #tpu.memory_space<vmem>>, vector<8x16x128xf32>
    %83 = vector.broadcast %78 : vector<1x1x128xf32> to vector<8x16x128xf32>
    %84 = arith.mulf %83, %82 : vector<8x16x128xf32>
    %85 = arith.addf %75, %84 : vector<8x16x128xf32>
    %c2_i32_62 = arith.constant 2 : i32
    %86 = arith.addi %65, %c2_i32_62 : i32
    %87 = arith.index_cast %86 : i32 to index
    %c0_63 = arith.constant 0 : index
    %c0_64 = arith.constant 0 : index
    %88 = vector.load %arg3[%87, %c0_63, %c0_64] : memref<5x1x128xf32, #tpu.memory_space<vmem>>, vector<1x1x128xf32>
    %c8_i32_65 = arith.constant 8 : i32
    %89 = arith.addi %c8_i32_65, %65 : i32
    %c2_i32_66 = arith.constant 2 : i32
    %90 = arith.addi %89, %c2_i32_66 : i32
    %91 = arith.index_cast %90 : i32 to index
    %c0_67 = arith.constant 0 : index
    %c0_68 = arith.constant 0 : index
    %92 = vector.load %arg7[%91, %c0_67, %c0_68] : memref<20x16x128xf32, #tpu.memory_space<vmem>>, vector<8x16x128xf32>
    %93 = vector.broadcast %88 : vector<1x1x128xf32> to vector<8x16x128xf32>
    %94 = arith.mulf %93, %92 : vector<8x16x128xf32>
    %95 = arith.addf %85, %94 : vector<8x16x128xf32>
    %c3_i32_69 = arith.constant 3 : i32
    %96 = arith.addi %65, %c3_i32_69 : i32
    %97 = arith.index_cast %96 : i32 to index
    %c0_70 = arith.constant 0 : index
    %c0_71 = arith.constant 0 : index
    %98 = vector.load %arg3[%97, %c0_70, %c0_71] : memref<5x1x128xf32, #tpu.memory_space<vmem>>, vector<1x1x128xf32>
    %c8_i32_72 = arith.constant 8 : i32
    %99 = arith.addi %c8_i32_72, %65 : i32
    %c3_i32_73 = arith.constant 3 : i32
    %100 = arith.addi %99, %c3_i32_73 : i32
    %101 = arith.index_cast %100 : i32 to index
    %c0_74 = arith.constant 0 : index
    %c0_75 = arith.constant 0 : index
    %102 = vector.load %arg7[%101, %c0_74, %c0_75] : memref<20x16x128xf32, #tpu.memory_space<vmem>>, vector<8x16x128xf32>
    %103 = vector.broadcast %98 : vector<1x1x128xf32> to vector<8x16x128xf32>
    %104 = arith.mulf %103, %102 : vector<8x16x128xf32>
    %105 = arith.addf %95, %104 : vector<8x16x128xf32>
    %c4_i32_76 = arith.constant 4 : i32
    %106 = arith.addi %65, %c4_i32_76 : i32
    %107 = arith.index_cast %106 : i32 to index
    %c0_77 = arith.constant 0 : index
    %c0_78 = arith.constant 0 : index
    %108 = vector.load %arg3[%107, %c0_77, %c0_78] : memref<5x1x128xf32, #tpu.memory_space<vmem>>, vector<1x1x128xf32>
    %c8_i32_79 = arith.constant 8 : i32
    %109 = arith.addi %c8_i32_79, %65 : i32
    %c4_i32_80 = arith.constant 4 : i32
    %110 = arith.addi %109, %c4_i32_80 : i32
    %111 = arith.index_cast %110 : i32 to index
    %c0_81 = arith.constant 0 : index
    %c0_82 = arith.constant 0 : index
    %112 = vector.load %arg7[%111, %c0_81, %c0_82] : memref<20x16x128xf32, #tpu.memory_space<vmem>>, vector<8x16x128xf32>
    %113 = vector.broadcast %108 : vector<1x1x128xf32> to vector<8x16x128xf32>
    %114 = arith.mulf %113, %112 : vector<8x16x128xf32>
    %115 = arith.addf %105, %114 : vector<8x16x128xf32>
    %c1_i32_83 = arith.constant 1 : i32
    %116 = vector.broadcast %6 : vector<1x1x128xf32> to vector<8x16x128xf32>
    %117 = arith.addf %115, %116 : vector<8x16x128xf32>
    %c0_84 = arith.constant 0 : index
    %c8 = arith.constant 8 : index
    %c0_85 = arith.constant 0 : index
    %c0_86 = arith.constant 0 : index
    %118 = vector.load %arg6[%c0_84, %c8, %c0_85, %c0_86] : memref<1x16x16x128xf32, #tpu.memory_space<vmem>>, vector<1x8x16x128xf32>
    %119 = vector.shape_cast %118 : vector<1x8x16x128xf32> to vector<8x16x128xf32>
    %120 = vector.shape_cast %117 : vector<8x16x128xf32> to vector<1x8x16x128xf32>
    tpu.vector_store %arg6[%c0_84, %c8, %c0_85, %c0_86], %120 {strides = array<i32>} : memref<1x16x16x128xf32, #tpu.memory_space<vmem>>, vector<1x8x16x128xf32>,
    return
  }
  func.func @transform_0(%arg0: i32, %arg1: i32, %arg2: i32) -> (i32, i32, i32) {
    %c0_i32 = arith.constant 0 : i32
    %c0_i32_0 = arith.constant 0 : i32
    %c0_i32_1 = arith.constant 0 : i32
    return %c0_i32, %c0_i32_0, %arg2 : i32, i32, i32
  }
  func.func @transform_1(%arg0: i32, %arg1: i32, %arg2: i32) -> (i32, i32, i32) {
    %c0_i32 = arith.constant 0 : i32
    %c0_i32_0 = arith.constant 0 : i32
    %c0_i32_1 = arith.constant 0 : i32
    return %c0_i32, %c0_i32_0, %arg2 : i32, i32, i32
  }
  func.func @transform_2(%arg0: i32, %arg1: i32, %arg2: i32) -> (i32, i32, i32, i32) {
    %c0_i32 = arith.constant 0 : i32
    %c0_i32_0 = arith.constant 0 : i32
    return %arg0, %c0_i32, %arg1, %arg2 : i32, i32, i32, i32
  }
  func.func @transform_3(%arg0: i32, %arg1: i32, %arg2: i32) -> (i32, i32, i32, i32) {
    %c0_i32 = arith.constant 0 : i32
    %c0_i32_0 = arith.constant 0 : i32
    return %arg0, %c0_i32, %arg1, %arg2 : i32, i32, i32, i32
  }
}

</mosaic_0001>

<bundles_post_ra>
// kernel: spatial_oversize_conv2d.2
= control target key start
LH: loop header
LB: loop body
LE: loop exit
PB: predicated region body
PF: predicated region fallthrough
CT: control target
= control target key end

     0   :  { %s1221_s12 = smov 0   ;;  %s1223_s13 = smov 0   ;;  %s1723_s0 = inlined_call_operand.vmem [shape: f32[5,1,128], index: 0, kind: input, shape index: {}]   ;;  %s1724_s1 = inlined_call_operand.vmem [shape: f32[1,1,128], index: 1, kind: input, shape index: {}]   ;;  %s1725_s2 = inlined_call_operand.vmem [shape: f32[2,16,16,128], index: 2, kind: input, shape index: {}]   ;;  %s1726_s3 = inlined_call_operand.vmem [shape: f32[2,16,16,128], index: 3, kind: output, shape index: {}]  }
   0x1   :  { %s1225_s14 = smov 0  }
   0x2 LB: > { %s32_s15 = sadd.s32 1, %s1195_s13  ;;  %p1109_p0 = scmp.ge.s32.totalorder %s1199_s14, 1  ;;  %s1199_s14 = sphi %s1225_s14, %s13_s14   ;;  %s1195_s13 = sphi %s1223_s13, %s1728_s13   ;;  %s1191_s12 = sphi %s1221_s12, %s1727_s12  }
   0x3   : > { %p34_p1 = scmp.ge.s32.totalorder %s32_s15, 2  ;;  %p188_p2 = scmp.lt.s32.totalorder %s1199_s14, 3 }
   0x5   : > { %s1730_s15 = smov (%p34_p1, %s32_s15), 0  ;;  %p189_p3 = pnand %p1109_p0, %p188_p2 }
   0x6   : > { %p239_p4 = scmp.lt.s32.totalorder (!%p189_p3), %s1191_s12, 1 }
   0x7   : > { %192 = sbr.rel (%p189_p3) target bundleno = 100 (0x64), region = 32 }
   0xc   : > { %v1242_v0 = vld [vmem:[%s1723_s0] ss:$0 sm:$0xff]  ;;  %v1248_v2 = vld [vmem:[%s1723_s0 + $0x1] ss:$0 sm:$0xff]  ;;  %s1732_s12 = smov (!%p239_p4, %s1191_s12), 1 }
   0xd   : > { %v366_v1 = vmul.f32 0.0, %v1242_v0  ;;  %v423_v3 = vmul.f32 0.0, %v1248_v2  ;;  %v1256_v4 = vld [vmem:[%s1723_s0 + $0x4] ss:$0 sm:$0xff]  ;;  %s1151_s22 = sshll.u32 %s1732_s12, 8 }
   0xe   : > { %v1262_v5 = vld [vmem:[%s1723_s0 + $0x2] ss:$0 sm:$0xff]  ;;  %v1267_v6 = vld [vmem:[%s1723_s0 + $0x3] ss:$0 sm:$0xff]  ;;  %s1274_s29 = scalar_lea.vmem %s1725_s2, %s1151_s22  ;;  %v1282_v11 = vmul.f32 0.0, %v1256_v4  ;;  %s1336_s7 = scalar_lea.vmem %s1726_s3, %s1151_s22 }
   0xf   : > { %v439_v7 = vadd.f32 %v423_v3, %v366_v1  ;;  %v277_v8 = vld [vmem:[%s1274_s29] sm:$0xff]  ;;  %v279_v9 = vld [vmem:[%s1274_s29 + $0x10] sm:$0xff]  ;;  %v278_v15 = vld [vmem:[%s1274_s29 + $0x8] sm:$0xff] }
  0x10   : > { %v1279_v10 = vld [vmem:[%s1274_s29 + $0x20] sm:$0xff]  ;;  %v479_v12 = vmul.f32 %v1262_v5, %v277_v8  ;;  %v536_v13 = vmul.f32 %v1267_v6, %v279_v9  ;;  %v280_v16 = vld [vmem:[%s1274_s29 + $0x18] sm:$0xff]  ;;  %v1291_v17 = vld [vmem:[%s1274_s29 + $0x28] sm:$0xff]  ;;  %v425_v18 = vmul.f32 %v1248_v2, %v277_v8  ;;  %v480_v19 = vmul.f32 %v1262_v5, %v278_v15 }
  0x11   : > { %v593_v14 = vmul.f32 %v1256_v4, %v1279_v10  ;;  %v537_v20 = vmul.f32 %v1267_v6, %v280_v16  ;;  %v594_v21 = vmul.f32 %v1256_v4, %v1291_v17  ;;  %v1299_v22 = vld [vmem:[%s1274_s29 + $0x30] sm:$0xff]  ;;  %v481_v23 = vmul.f32 %v1262_v5, %v279_v9  ;;  %v1307_v29 = vld [vmem:[%s1274_s29 + $0x38] sm:$0xff]  ;;  %v1319_v37 = vld [vmem:[%s1724_s1] ss:$0 sm:$0xff] }
  0x12   : > { %v495_v24 = vadd.f32 %v479_v12, %v439_v7  ;;  %v441_v25 = vadd.f32 %v425_v18, %v366_v1  ;;  %v538_v26 = vmul.f32 %v1267_v6, %v1279_v10  ;;  %v595_v27 = vmul.f32 %v1256_v4, %v1299_v22  ;;  %v1322_v40 = vld [vmem:[%s1274_s29 + $0x40] sm:$0xff]  ;;  %v1345_v58 = vld [vmem:[%s1274_s29 + $0x48] sm:$0xff] }
  0x13   : > { %v496_v28 = vadd.f32 %v480_v19, %v439_v7  ;;  %v426_v30 = vmul.f32 %v1248_v2, %v278_v15  ;;  %v482_v31 = vmul.f32 %v1262_v5, %v280_v16  ;;  %v539_v32 = vmul.f32 %v1267_v6, %v1291_v17  ;;  %v1356_v7 = vld [vmem:[%s1274_s29 + $0x50] sm:$0xff] }
  0x14   : > { %v552_v33 = vadd.f32 %v536_v13, %v495_v24  ;;  %v497_v34 = vadd.f32 %v481_v23, %v441_v25  ;;  %v596_v35 = vmul.f32 %v1256_v4, %v1307_v29  ;;  %v370_v36 = vmul.f32 %v1242_v0, %v277_v8 }
  0x15   : > { %v553_v38 = vadd.f32 %v537_v20, %v496_v28  ;;  %v442_v39 = vadd.f32 %v426_v30, %v366_v1  ;;  %v427_v41 = vmul.f32 %v1248_v2, %v279_v9  ;;  %v483_v42 = vmul.f32 %v1262_v5, %v1279_v10 }
  0x16   : > { %v609_v43 = vadd.f32 %v593_v14, %v552_v33  ;;  %v554_v44 = vadd.f32 %v538_v26, %v497_v34  ;;  %v540_v45 = vmul.f32 %v1267_v6, %v1299_v22  ;;  %v597_v46 = vmul.f32 %v1256_v4, %v1322_v40  ;;  %v1385_v33 = vld [vmem:[%s1274_s29 + $0x60] sm:$0xff] }
  0x17   : > { %v610_v47 = vadd.f32 %v594_v21, %v553_v38  ;;  %v498_v48 = vadd.f32 %v482_v31, %v442_v39  ;;  %v443_v49 = vadd.f32 %v427_v41, %v370_v36  ;;  %v371_v50 = vmul.f32 %v1242_v0, %v278_v15  ;;  %v1370_v21 = vld [vmem:[%s1274_s29 + $0x58] sm:$0xff] }
  0x18   : > { %v631_v51 = vadd.f32 %v1319_v37, %v609_v43  ;;  %v611_v52 = vadd.f32 %v595_v27, %v554_v44  ;;  %v428_v53 = vmul.f32 %v1248_v2, %v280_v16  ;;  %v484_v54 = vmul.f32 %v1262_v5, %v1291_v17  ;;  %v1400_v44 = vld [vmem:[%s1274_s29 + $0x68] sm:$0xff] }
  0x19   : > { %v632_v55 = vadd.f32 %v1319_v37, %v610_v47  ;;  %v555_v56 = vadd.f32 %v539_v32, %v498_v48  ;;  %v499_v57 = vadd.f32 %v483_v42, %v443_v49  ;;  %v541_v59 = vmul.f32 %v1267_v6, %v1307_v29 }
  0x1a   : > { %647 = vst [vmem:[%s1336_s7] sm:$0xff] %v631_v51  ;;  %v633_v60 = vadd.f32 %v1319_v37, %v611_v52  ;;  %v444_v61 = vadd.f32 %v428_v53, %v371_v50  ;;  %v598_v62 = vmul.f32 %v1256_v4, %v1345_v58  ;;  %v372_v63 = vmul.f32 %v1242_v0, %v279_v9 }
  0x1b   : > { %648 = vst [vmem:[%s1336_s7 + $0x8] sm:$0xff] %v632_v55  ;;  %v612_v1 = vadd.f32 %v596_v35, %v555_v56  ;;  %v556_v3 = vadd.f32 %v540_v45, %v499_v57  ;;  %v429_v8 = vmul.f32 %v1248_v2, %v1279_v10  ;;  %v485_v12 = vmul.f32 %v1262_v5, %v1299_v22  ;;  %v1417_v56 = vld [vmem:[%s1274_s29 + $0x70] sm:$0xff] }
  0x1c   : > { %649 = vst [vmem:[%s1336_s7 + $0x10] sm:$0xff] %v633_v60  ;;  %v500_v13 = vadd.f32 %v484_v54, %v444_v61  ;;  %v542_v14 = vmul.f32 %v1267_v6, %v1322_v40  ;;  %v599_v9 = vmul.f32 %v1256_v4, %v1356_v7  ;;  %v373_v15 = vmul.f32 %v1242_v0, %v280_v16 }
  0x1d   : > { %v634_v18 = vadd.f32 %v1319_v37, %v612_v1  ;;  %v613_v19 = vadd.f32 %v597_v46, %v556_v3  ;;  %v445_v20 = vadd.f32 %v429_v8, %v372_v63  ;;  %v430_v23 = vmul.f32 %v1248_v2, %v1291_v17 }
  0x1e   : > { %v557_v24 = vadd.f32 %v541_v59, %v500_v13  ;;  %v486_v25 = vmul.f32 %v1262_v5, %v1307_v29  ;;  %v543_v26 = vmul.f32 %v1267_v6, %v1345_v58  ;;  %v600_v16 = vmul.f32 %v1256_v4, %v1370_v21 }
  0x1f   : > { %650 = vst [vmem:[%s1336_s7 + $0x18] sm:$0xff] %v634_v18  ;;  %v635_v27 = vadd.f32 %v1319_v37, %v613_v19  ;;  %v501_v28 = vadd.f32 %v485_v12, %v445_v20  ;;  %v446_v30 = vadd.f32 %v430_v23, %v373_v15  ;;  %v374_v31 = vmul.f32 %v1242_v0, %v1279_v10 }
  0x20   : > { %v614_v32 = vadd.f32 %v598_v62, %v557_v24  ;;  %v431_v34 = vmul.f32 %v1248_v2, %v1299_v22  ;;  %v487_v35 = vmul.f32 %v1262_v5, %v1322_v40  ;;  %v544_v36 = vmul.f32 %v1267_v6, %v1356_v7 }
  0x21   : > { %651 = vst [vmem:[%s1336_s7 + $0x20] sm:$0xff] %v635_v27  ;;  %v558_v38 = vadd.f32 %v542_v14, %v501_v28  ;;  %v502_v39 = vadd.f32 %v486_v25, %v446_v30  ;;  %v601_v41 = vmul.f32 %v1256_v4, %v1385_v33  ;;  %v375_v10 = vmul.f32 %v1242_v0, %v1291_v17 }
  0x22   : > { %v636_v42 = vadd.f32 %v1319_v37, %v614_v32  ;;  %v447_v43 = vadd.f32 %v431_v34, %v374_v31  ;;  %v432_v45 = vmul.f32 %v1248_v2, %v1307_v29  ;;  %v488_v46 = vmul.f32 %v1262_v5, %v1345_v58 }
  0x23   : > { %v615_v47 = vadd.f32 %v599_v9, %v558_v38  ;;  %v559_v48 = vadd.f32 %v543_v26, %v502_v39  ;;  %v545_v49 = vmul.f32 %v1267_v6, %v1370_v21  ;;  %v602_v17 = vmul.f32 %v1256_v4, %v1400_v44  ;;  %v1434_v9 = vld [vmem:[%s1274_s29 + $0x78] sm:$0xff]  ;;  %v1447_v26 = vld [vmem:[%s1274_s29 + $0x80] sm:$0xff]  ;;  %v1462_v39 = vld [vmem:[%s1274_s29 + $0x88] sm:$0xff] }
  0x24   : > { %652 = vst [vmem:[%s1336_s7 + $0x28] sm:$0xff] %v636_v42  ;;  %v503_v50 = vadd.f32 %v487_v35, %v447_v43  ;;  %v448_v51 = vadd.f32 %v432_v45, %v375_v10  ;;  %v376_v52 = vmul.f32 %v1242_v0, %v1299_v22  ;;  %v433_v53 = vmul.f32 %v1248_v2, %v1322_v40 }
  0x25   : > { %v637_v54 = vadd.f32 %v1319_v37, %v615_v47  ;;  %v616_v55 = vadd.f32 %v600_v16, %v559_v48  ;;  %v489_v57 = vmul.f32 %v1262_v5, %v1356_v7  ;;  %v546_v59 = vmul.f32 %v1267_v6, %v1385_v33  ;;  %v1475_v48 = vld [vmem:[%s1274_s29 + $0x90] sm:$0xff] }
  0x26   : > { %v560_v60 = vadd.f32 %v544_v36, %v503_v50  ;;  %v504_v61 = vadd.f32 %v488_v46, %v448_v51  ;;  %v449_v62 = vadd.f32 %v433_v53, %v376_v52  ;;  %v603_v22 = vmul.f32 %v1256_v4, %v1417_v56 }
  0x27   : > { %653 = vst [vmem:[%s1336_s7 + $0x30] sm:$0xff] %v637_v54  ;;  %v638_v63 = vadd.f32 %v1319_v37, %v616_v55  ;;  %v377_v1 = vmul.f32 %v1242_v0, %v1307_v29  ;;  %v434_v3 = vmul.f32 %v1248_v2, %v1345_v58  ;;  %v490_v8 = vmul.f32 %v1262_v5, %v1370_v21 }
  0x28   : > { %v617_v12 = vadd.f32 %v601_v41, %v560_v60  ;;  %v561_v13 = vadd.f32 %v545_v49, %v504_v61  ;;  %v505_v14 = vadd.f32 %v489_v57, %v449_v62  ;;  %v547_v15 = vmul.f32 %v1267_v6, %v1400_v44  ;;  %v1490_v57 = vld [vmem:[%s1274_s29 + $0x98] sm:$0xff] }
  0x29   : > { %654 = vst [vmem:[%s1336_s7 + $0x38] sm:$0xff] %v638_v63  ;;  %v450_v18 = vadd.f32 %v434_v3, %v377_v1  ;;  %v604_v29 = vmul.f32 %v1256_v4, %v1434_v9  ;;  %v378_v19 = vmul.f32 %v1242_v0, %v1322_v40  ;;  %v435_v20 = vmul.f32 %v1248_v2, %v1356_v7 }
  0x2a   : > { %v639_v23 = vadd.f32 %v1319_v37, %v617_v12  ;;  %v618_v24 = vadd.f32 %v602_v17, %v561_v13  ;;  %v562_v25 = vadd.f32 %v546_v59, %v505_v14  ;;  %v491_v16 = vmul.f32 %v1262_v5, %v1385_v33  ;;  %v1505_v12 = vld [vmem:[%s1274_s29 + $0xa0] sm:$0xff] }
  0x2b   : > { %v506_v27 = vadd.f32 %v490_v8, %v450_v18  ;;  %v451_v28 = vadd.f32 %v435_v20, %v378_v19  ;;  %v548_v30 = vmul.f32 %v1267_v6, %v1417_v56  ;;  %v605_v40 = vmul.f32 %v1256_v4, %v1447_v26 }
  0x2c   : > { %655 = vst [vmem:[%s1336_s7 + $0x40] sm:$0xff] %v639_v23  ;;  %v640_v31 = vadd.f32 %v1319_v37, %v618_v24  ;;  %v619_v32 = vadd.f32 %v603_v22, %v562_v25  ;;  %v379_v34 = vmul.f32 %v1242_v0, %v1345_v58  ;;  %v436_v35 = vmul.f32 %v1248_v2, %v1370_v21  ;;  %v1520_v24 = vld [vmem:[%s1274_s29 + $0xa8] sm:$0xff] }
  0x2d   : > { %v563_v36 = vadd.f32 %v547_v15, %v506_v27  ;;  %v507_v38 = vadd.f32 %v491_v16, %v451_v28  ;;  %v492_v41 = vmul.f32 %v1262_v5, %v1400_v44  ;;  %v549_v10 = vmul.f32 %v1267_v6, %v1434_v9 }
  0x2e   : > { %656 = vst [vmem:[%s1336_s7 + $0x48] sm:$0xff] %v640_v31  ;;  %v641_v42 = vadd.f32 %v1319_v37, %v619_v32  ;;  %v452_v43 = vadd.f32 %v436_v35, %v379_v34  ;;  %v606_v58 = vmul.f32 %v1256_v4, %v1462_v39  ;;  %v380_v45 = vmul.f32 %v1242_v0, %v1356_v7 }
  0x2f   : > { %v620_v46 = vadd.f32 %v604_v29, %v563_v36  ;;  %v564_v47 = vadd.f32 %v548_v30, %v507_v38  ;;  %v437_v49 = vmul.f32 %v1248_v2, %v1385_v33  ;;  %v493_v17 = vmul.f32 %v1262_v5, %v1417_v56  ;;  %v1537_v38 = vld [vmem:[%s1274_s29 + $0xb0] sm:$0xff] }
  0x30   : > { %657 = vst [vmem:[%s1336_s7 + $0x50] sm:$0xff] %v641_v42  ;;  %v508_v50 = vadd.f32 %v492_v41, %v452_v43  ;;  %v550_v51 = vmul.f32 %v1267_v6, %v1447_v26  ;;  %v607_v52 = vmul.f32 %v1256_v4, %v1475_v48  ;;  %v381_v7 = vmul.f32 %v1242_v0, %v1370_v21 }
  0x31   : > { %v642_v53 = vadd.f32 %v1319_v37, %v620_v46  ;;  %v621_v54 = vadd.f32 %v605_v40, %v564_v47  ;;  %v453_v55 = vadd.f32 %v437_v49, %v380_v45  ;;  %v438_v59 = vmul.f32 %v1248_v2, %v1400_v44 }
  0x32   : > { %v565_v60 = vadd.f32 %v549_v10, %v508_v50  ;;  %v494_v61 = vmul.f32 %v1262_v5, %v1434_v9  ;;  %v551_v62 = vmul.f32 %v1267_v6, %v1462_v39  ;;  %v608_v21 = vmul.f32 %v1256_v4, %v1490_v57 }
  0x33   : > { %658 = vst [vmem:[%s1336_s7 + $0x58] sm:$0xff] %v642_v53  ;;  %v643_v22 = vadd.f32 %v1319_v37, %v621_v54  ;;  %v509_v63 = vadd.f32 %v493_v17, %v453_v55  ;;  %v454_v1 = vadd.f32 %v438_v59, %v381_v7  ;;  %v687_v3 = vmul.f32 %v1242_v0, %v1385_v33 }
  0x34   : > { %v622_v8 = vadd.f32 %v606_v58, %v565_v60  ;;  %v743_v13 = vmul.f32 %v1248_v2, %v1417_v56  ;;  %v799_v14 = vmul.f32 %v1262_v5, %v1447_v26  ;;  %v855_v15 = vmul.f32 %v1267_v6, %v1475_v48 }
  0x35   : > { %659 = vst [vmem:[%s1336_s7 + $0x60] sm:$0xff] %v643_v22  ;;  %v566_v18 = vadd.f32 %v550_v51, %v509_v63  ;;  %v510_v29 = vadd.f32 %v494_v61, %v454_v1  ;;  %v911_v19 = vmul.f32 %v1256_v4, %v1505_v12  ;;  %v688_v33 = vmul.f32 %v1242_v0, %v1400_v44 }
  0x36   : > { %v644_v20 = vadd.f32 %v1319_v37, %v622_v8  ;;  %v759_v23 = vadd.f32 %v743_v13, %v687_v3  ;;  %v744_v25 = vmul.f32 %v1248_v2, %v1434_v9  ;;  %v800_v16 = vmul.f32 %v1262_v5, %v1462_v39 }
  0x37   : > { %v623_v27 = vadd.f32 %v607_v52, %v566_v18  ;;  %v567_v28 = vadd.f32 %v551_v62, %v510_v29  ;;  %v856_v30 = vmul.f32 %v1267_v6, %v1490_v57  ;;  %v912_v44 = vmul.f32 %v1256_v4, %v1520_v24  ;;  %v1554_v52 = vld [vmem:[%s1274_s29 + $0xb8] sm:$0xff]  ;;  %v1567_v62 = vld [vmem:[%s1274_s29 + $0xc0] sm:$0xff]  ;;  %v1582_v29 = vld [vmem:[%s1274_s29 + $0xc8] sm:$0xff] }
  0x38   : > { %660 = vst [vmem:[%s1336_s7 + $0x68] sm:$0xff] %v644_v20  ;;  %v815_v40 = vadd.f32 %v799_v14, %v759_v23  ;;  %v760_v31 = vadd.f32 %v744_v25, %v688_v33  ;;  %v689_v32 = vmul.f32 %v1242_v0, %v1417_v56  ;;  %v745_v34 = vmul.f32 %v1248_v2, %v1447_v26 }
  0x39   : > { %v645_v35 = vadd.f32 %v1319_v37, %v623_v27  ;;  %v624_v36 = vadd.f32 %v608_v21, %v567_v28  ;;  %v801_v41 = vmul.f32 %v1262_v5, %v1475_v48  ;;  %v857_v10 = vmul.f32 %v1267_v6, %v1505_v12  ;;  %v1595_v28 = vld [vmem:[%s1274_s29 + $0xd0] sm:$0xff] }
  0x3a   : > { %v871_v42 = vadd.f32 %v855_v15, %v815_v40  ;;  %v816_v43 = vadd.f32 %v800_v16, %v760_v31  ;;  %v761_v58 = vadd.f32 %v745_v34, %v689_v32  ;;  %v913_v56 = vmul.f32 %v1256_v4, %v1537_v38 }
  0x3b   : > { %661 = vst [vmem:[%s1336_s7 + $0x70] sm:$0xff] %v645_v35  ;;  %v646_v45 = vadd.f32 %v1319_v37, %v624_v36  ;;  %v690_v46 = vmul.f32 %v1242_v0, %v1434_v9  ;;  %v746_v47 = vmul.f32 %v1248_v2, %v1462_v39  ;;  %v802_v49 = vmul.f32 %v1262_v5, %v1490_v57 }
  0x3c   : > { %v927_v17 = vadd.f32 %v911_v19, %v871_v42  ;;  %v872_v50 = vadd.f32 %v856_v30, %v816_v43  ;;  %v817_v51 = vadd.f32 %v801_v41, %v761_v58  ;;  %v858_v7 = vmul.f32 %v1267_v6, %v1520_v24  ;;  %v1610_v41 = vld [vmem:[%s1274_s29 + $0xd8] sm:$0xff] }
  0x3d   : > { %662 = vst [vmem:[%s1336_s7 + $0x78] sm:$0xff] %v646_v45  ;;  %v762_v53 = vadd.f32 %v746_v47, %v690_v46  ;;  %v914_v9 = vmul.f32 %v1256_v4, %v1554_v52  ;;  %v691_v54 = vmul.f32 %v1242_v0, %v1447_v26  ;;  %v747_v55 = vmul.f32 %v1248_v2, %v1475_v48 }
  0x3e   : > { %v943_v59 = vadd.f32 %v1319_v37, %v927_v17  ;;  %v928_v60 = vadd.f32 %v912_v44, %v872_v50  ;;  %v873_v61 = vadd.f32 %v857_v10, %v817_v51  ;;  %v803_v21 = vmul.f32 %v1262_v5, %v1505_v12  ;;  %v1625_v17 = vld [vmem:[%s1274_s29 + $0xe0] sm:$0xff] }
  0x3f   : > { %v818_v22 = vadd.f32 %v802_v49, %v762_v53  ;;  %v763_v63 = vadd.f32 %v747_v55, %v691_v54  ;;  %v859_v1 = vmul.f32 %v1267_v6, %v1537_v38  ;;  %v915_v26 = vmul.f32 %v1256_v4, %v1567_v62 }
  0x40   : > { %1133 = vst [vmem:[%s1336_s7 + $0x80] sm:$0xff] %v943_v59  ;;  %v944_v3 = vadd.f32 %v1319_v37, %v928_v60  ;;  %v929_v8 = vadd.f32 %v913_v56, %v873_v61  ;;  %v692_v13 = vmul.f32 %v1242_v0, %v1462_v39  ;;  %v748_v14 = vmul.f32 %v1248_v2, %v1490_v57  ;;  %v306_v60 = vld [vmem:[%s1274_s29 + $0xe8] sm:$0xff] }
  0x41   : > { %v874_v15 = vadd.f32 %v858_v7, %v818_v22  ;;  %v819_v18 = vadd.f32 %v803_v21, %v763_v63  ;;  %v804_v19 = vmul.f32 %v1262_v5, %v1520_v24  ;;  %v860_v33 = vmul.f32 %v1267_v6, %v1554_v52 }
  0x42   : > { %1134 = vst [vmem:[%s1336_s7 + $0x88] sm:$0xff] %v944_v3  ;;  %v945_v20 = vadd.f32 %v1319_v37, %v929_v8  ;;  %v764_v23 = vadd.f32 %v748_v14, %v692_v13  ;;  %v916_v39 = vmul.f32 %v1256_v4, %v1582_v29  ;;  %v693_v25 = vmul.f32 %v1242_v0, %v1475_v48 }
  0x43   : > { %v930_v16 = vadd.f32 %v914_v9, %v874_v15  ;;  %v875_v27 = vadd.f32 %v859_v1, %v819_v18  ;;  %v749_v30 = vmul.f32 %v1248_v2, %v1505_v12  ;;  %v805_v44 = vmul.f32 %v1262_v5, %v1537_v38  ;;  %v307_v18 = vld [vmem:[%s1274_s29 + $0xf0] sm:$0xff] }
  0x44   : > { %1135 = vst [vmem:[%s1336_s7 + $0x90] sm:$0xff] %v945_v20  ;;  %v820_v40 = vadd.f32 %v804_v19, %v764_v23  ;;  %v861_v31 = vmul.f32 %v1267_v6, %v1567_v62  ;;  %v917_v32 = vmul.f32 %v1256_v4, %v1595_v28  ;;  %v694_v48 = vmul.f32 %v1242_v0, %v1490_v57 }
  0x45   : > { %v946_v34 = vadd.f32 %v1319_v37, %v930_v16  ;;  %v931_v35 = vadd.f32 %v915_v26, %v875_v27  ;;  %v765_v36 = vadd.f32 %v749_v30, %v693_v25  ;;  %v750_v10 = vmul.f32 %v1248_v2, %v1520_v24 }
  0x46   : > { %v876_v42 = vadd.f32 %v860_v33, %v820_v40  ;;  %v806_v43 = vmul.f32 %v1262_v5, %v1554_v52  ;;  %v862_v58 = vmul.f32 %v1267_v6, %v1582_v29  ;;  %v918_v57 = vmul.f32 %v1256_v4, %v1610_v41 }
  0x47   : > { %1136 = vst [vmem:[%s1336_s7 + $0x98] sm:$0xff] %v946_v34  ;;  %v947_v56 = vadd.f32 %v1319_v37, %v931_v35  ;;  %v821_v45 = vadd.f32 %v805_v44, %v765_v36  ;;  %v766_v46 = vadd.f32 %v750_v10, %v694_v48  ;;  %v695_v47 = vmul.f32 %v1242_v0, %v1505_v12 }
  0x48   : > { %v932_v49 = vadd.f32 %v916_v39, %v876_v42  ;;  %v751_v50 = vmul.f32 %v1248_v2, %v1537_v38  ;;  %v807_v51 = vmul.f32 %v1262_v5, %v1567_v62  ;;  %v863_v7 = vmul.f32 %v1267_v6, %v1595_v28 }
  0x49   : > { %1137 = vst [vmem:[%s1336_s7 + $0xa0] sm:$0xff] %v947_v56  ;;  %v877_v53 = vadd.f32 %v861_v31, %v821_v45  ;;  %v822_v9 = vadd.f32 %v806_v43, %v766_v46  ;;  %v919_v54 = vmul.f32 %v1256_v4, %v1625_v17  ;;  %v696_v12 = vmul.f32 %v1242_v0, %v1520_v24 }
  0x4a   : > { %v948_v55 = vadd.f32 %v1319_v37, %v932_v49  ;;  %v767_v59 = vadd.f32 %v751_v50, %v695_v47  ;;  %v752_v61 = vmul.f32 %v1248_v2, %v1554_v52  ;;  %v808_v21 = vmul.f32 %v1262_v5, %v1582_v29 }
  0x4b   : > { %v933_v22 = vadd.f32 %v917_v32, %v877_v53  ;;  %v878_v63 = vadd.f32 %v862_v58, %v822_v9  ;;  %v864_v1 = vmul.f32 %v1267_v6, %v1610_v41  ;;  %v920_v26 = vmul.f32 %v1256_v4, %v306_v60  ;;  %v308_v32 = vld [vmem:[%s1274_s29 + $0xf8] sm:$0xff] }
  0x4c   : > { %1138 = vst [vmem:[%s1336_s7 + $0xa8] sm:$0xff] %v948_v55  ;;  %v823_v24 = vadd.f32 %v807_v51, %v767_v59  ;;  %v768_v3 = vadd.f32 %v752_v61, %v696_v12  ;;  %v697_v8 = vmul.f32 %v1242_v0, %v1537_v38  ;;  %v753_v13 = vmul.f32 %v1248_v2, %v1567_v62 }
  0x4d   : > { %v949_v14 = vadd.f32 %v1319_v37, %v933_v22  ;;  %v934_v15 = vadd.f32 %v918_v57, %v878_v63  ;;  %v809_v19 = vmul.f32 %v1262_v5, %v1595_v28  ;;  %v865_v33 = vmul.f32 %v1267_v6, %v1625_v17 }
  0x4e   : > { %v879_v20 = vadd.f32 %v863_v7, %v823_v24  ;;  %v824_v23 = vadd.f32 %v808_v21, %v768_v3  ;;  %v769_v39 = vadd.f32 %v753_v13, %v697_v8  ;;  %v921_v38 = vmul.f32 %v1256_v4, %v307_v18 }
  0x4f   : > { %1139 = vst [vmem:[%s1336_s7 + $0xb0] sm:$0xff] %v949_v14  ;;  %v950_v25 = vadd.f32 %v1319_v37, %v934_v15  ;;  %v698_v16 = vmul.f32 %v1242_v0, %v1554_v52  ;;  %v754_v27 = vmul.f32 %v1248_v2, %v1582_v29  ;;  %v810_v30 = vmul.f32 %v1262_v5, %v1610_v41 }
  0x50   : > { %v935_v44 = vadd.f32 %v919_v54, %v879_v20  ;;  %v880_v40 = vadd.f32 %v864_v1, %v824_v23  ;;  %v825_v31 = vadd.f32 %v809_v19, %v769_v39  ;;  %v866_v48 = vmul.f32 %v1267_v6, %v306_v60 }
  0x51   : > { %1140 = vst [vmem:[%s1336_s7 + $0xb8] sm:$0xff] %v950_v25  ;;  %v770_v34 = vadd.f32 %v754_v27, %v698_v16  ;;  %v922_v35 = vmul.f32 %v1256_v4, %v308_v32  ;;  %v699_v52 = vmul.f32 %v1242_v0, %v1567_v62  ;;  %v755_v36 = vmul.f32 %v1248_v2, %v1595_v28 }
  0x52   : > { %v951_v10 = vadd.f32 %v1319_v37, %v935_v44  ;;  %v936_v42 = vadd.f32 %v920_v26, %v880_v40  ;;  %v881_v43 = vadd.f32 %v865_v33, %v825_v31  ;;  %v811_v58 = vmul.f32 %v1262_v5, %v1625_v17 }
  0x53   : > { %v826_v57 = vadd.f32 %v810_v30, %v770_v34  ;;  %v771_v56 = vadd.f32 %v755_v36, %v699_v52  ;;  %v867_v45 = vmul.f32 %v1267_v6, %v307_v18  ;;  %v700_v4 = vmul.f32 %v1242_v0, %v1582_v29 }
  0x54   : > { %1141 = vst [vmem:[%s1336_s7 + $0xc0] sm:$0xff] %v951_v10  ;;  %v952_v62 = vadd.f32 %v1319_v37, %v936_v42  ;;  %v937_v46 = vadd.f32 %v921_v38, %v881_v43  ;;  %v756_v47 = vmul.f32 %v1248_v2, %v1610_v41  ;;  %v812_v49 = vmul.f32 %v1262_v5, %v306_v60 }
  0x55   : > { %v882_v50 = vadd.f32 %v866_v48, %v826_v57  ;;  %v827_v51 = vadd.f32 %v811_v58, %v771_v56  ;;  %v868_v7 = vmul.f32 %v1267_v6, %v308_v32  ;;  %v701_v53 = vmul.f32 %v1242_v0, %v1595_v28 }
  0x56   : > { %1142 = vst [vmem:[%s1336_s7 + $0xc8] sm:$0xff] %v952_v62  ;;  %v953_v29 = vadd.f32 %v1319_v37, %v937_v46  ;;  %v772_v9 = vadd.f32 %v756_v47, %v700_v4  ;;  %v757_v54 = vmul.f32 %v1248_v2, %v1625_v17  ;;  %v813_v12 = vmul.f32 %v1262_v5, %v307_v18 }
  0x57   : > { %v938_v55 = vadd.f32 %v922_v35, %v882_v50  ;;  %v883_v59 = vadd.f32 %v867_v45, %v827_v51  ;;  %v702_v61 = vmul.f32 %v1242_v0, %v1610_v41  ;;  %v758_v21 = vmul.f32 %v1248_v2, %v306_v60 }
  0x58   : > { %1143 = vst [vmem:[%s1336_s7 + $0xd0] sm:$0xff] %v953_v29  ;;  %v828_v28 = vadd.f32 %v812_v49, %v772_v9  ;;  %v773_v22 = vadd.f32 %v757_v54, %v701_v53  ;;  %v869_v63 = vmul.f32 0.0, %v1267_v6  ;;  %v814_v1 = vmul.f32 %v1262_v5, %v308_v32 }
  0x59   : > { %v954_v17 = vadd.f32 %v1319_v37, %v938_v55  ;;  %v939_v26 = vadd.f32 %v1282_v11, %v883_v59  ;;  %v774_v24 = vadd.f32 %v758_v21, %v702_v61 }
  0x5a   : > { %v884_v3 = vadd.f32 %v868_v7, %v828_v28  ;;  %v829_v0 = vadd.f32 %v813_v12, %v773_v22 }
  0x5b   : > { %1144 = vst [vmem:[%s1336_s7 + $0xd8] sm:$0xff] %v954_v17  ;;  %v955_v2 = vadd.f32 %v1319_v37, %v939_v26  ;;  %v830_v41 = vadd.f32 %v814_v1, %v774_v24 }
  0x5c   : > { %v940_v60 = vadd.f32 %v1282_v11, %v884_v3  ;;  %v885_v8 = vadd.f32 %v869_v63, %v829_v0 }
  0x5d   : > { %1145 = vst [vmem:[%s1336_s7 + $0xe0] sm:$0xff] %v955_v2  ;;  %v886_v6 = vadd.f32 %v869_v63, %v830_v41 }
  0x5e   : > { %v956_v5 = vadd.f32 %v1319_v37, %v940_v60  ;;  %v941_v13 = vadd.f32 %v1282_v11, %v885_v8 }
  0x5f   : > { %v942_v14 = vadd.f32 %v1282_v11, %v886_v6 }
  0x60   : > { %1146 = vst [vmem:[%s1336_s7 + $0xe8] sm:$0xff] %v956_v5  ;;  %v957_v15 = vadd.f32 %v1319_v37, %v941_v13 }
  0x61   : > { %v958_v18 = vadd.f32 %v1319_v37, %v942_v14 }
  0x62   : > { %1147 = vst [vmem:[%s1336_s7 + $0xf0] sm:$0xff] %v957_v15 }
  0x63   : > { %1148 = vst [vmem:[%s1336_s7 + $0xf8] sm:$0xff] %v958_v18 }
  0x64 PF: > { %s13_s14 = sadd.s32 1, %s1199_s14   ;;  %s1727_s12 = smov %s1195_s13 }
  0x65   : > { %p10_p5 = scmp.ge.s32.totalorder %s13_s14, 4   ;;  %s1728_s13 = smov %s1730_s15 }
  0x67   :  { %12 = sbr.rel (!%p10_p5) target bundleno = 2 (0x2), region = 87 }

</bundles_post_ra>
